<compile_context>
chip_gen: v5e
topology: v5e:2x2
jax: 0.10.0
libtpu: 0.0.40
codegen_flags: <defaults>
</compile_context>

<pallas_src>
import jax
import jax.numpy as jnp
from jax.experimental import pallas as pl
from jax.experimental.pallas import tpu as pltpu

K = 5
K2 = 2 * K
P_ROWS = 35          # packed parameter buffer: 10(w1)+1(b1)+20(w2)+1(b2)+3(dec)
P_COLS = 20


def _softplus(x):
    # Single-exp, overflow-free softplus (beta=1): max(x,0) + log1p(exp(-|x|)).
    return jnp.maximum(x, 0.0) + jnp.log1p(jnp.exp(-jnp.abs(x)))


def _round_up(n, m):
    return ((n + m - 1) // m) * m


def toynet_kernel(x_ref, eps_ref, p_ref,
                  mu_ref, std_ref, logit_ref, mu2_ref, std2_ref):
    x = x_ref[...]                        # (tb, 10)
    eps = eps_ref[...]                    # (tb, K)
    P = p_ref[...]                        # (35, 20) packed parameters

    # Static (cheap) slices of the packed parameter buffer.
    w1 = P[0:10, :]                       # (10, 20)
    b1 = P[10:11, :]                      # (1, 20)
    w2 = P[11:31, 0:K2]                   # (20, 2K)
    b2 = P[31:32, 0:K2]                   # (1, 2K)
    wd_row = P[32:33, 0:K]                # (1, K)   decode weight as a row
    bd = P[32:33, K:K + 1]                # (1, 1)
    wbw = P[33:34, 0:K2]                  # (1, 2K)
    bbw = P[34:35, 0:K2]                  # (1, 2K)

    # --- encode: Linear(10,20)+ReLU, then ONE fused Linear(20,2K) matmul ----
    h = jnp.maximum(jnp.dot(x, w1, preferred_element_type=jnp.float32) + b1, 0.0)
    stats = jnp.dot(h, w2, preferred_element_type=jnp.float32) + b2      # (tb, 2K)

    mu = stats[:, 0:K]
    std = _softplus(stats[:, K:K2] - 5.0)

    # --- reparametrize (n=1) + decode Linear(K,1) as VPU mul + lane reduce --
    enc = mu + eps * std
    logit = jnp.sum(enc * wd_row, axis=-1, keepdims=True) + bd           # (tb, 1)

    # --- bwencode Linear(1,2K): contraction dim is 1 -> broadcasted multiply
    stats2 = logit * wbw + bbw                                           # (tb, 2K)
    mu2 = stats2[:, 0:K]
    std2 = _softplus(stats2[:, K:K2] - 5.0)

    # --- one full-block store per output (no per-iteration zero fill) -------
    mu_ref[...] = mu
    std_ref[...] = std
    logit_ref[...] = logit
    mu2_ref[...] = mu2
    std2_ref[...] = std2


def _pick_tile_and_vmem(batch_tile):
    """Generation-aware tile cap + explicit scoped-VMEM limit."""
    try:
        cap = int(pltpu.get_tpu_info().vmem_capacity_bytes)
    except Exception:
        cap = 64 << 20                    # conservative: v7x per-core VMEM
    vmem_limit = min(cap // 2, 64 << 20)  # 64 MiB on v5e/v6e, 32 MiB on v7x
    if batch_tile is None:
        batch_tile = 4096 if vmem_limit >= (64 << 20) else 2048
    return batch_tile, vmem_limit


def toynet_forward(x, packed_params, eps, *, batch_tile=None):
    """Full ToyNet forward in one Pallas call, 1-D parallel grid over batch."""
    B = x.shape[0]
    tile_cap, vmem_limit = _pick_tile_and_vmem(batch_tile)

    # Tile selection: multiple of 8 sublanes, <= tile_cap, and <= ~ceil(B/2) so
    # the grid has >=2 steps (v7x megacore) whenever the batch allows it.
    if B <= 8:
        tb = B                                   # block == full array dims
    else:
        tb = min(tile_cap, max(8, _round_up(pl.cdiv(B, 2), 8)))
    grid = (pl.cdiv(B, tb),)                     # ragged last block is fine

    pp = packed_params                           # (35, 20)

    cost = pl.CostEstimate(
        flops=B * (2 * 10 * 20 + 2 * 20 * K2 + 6 * K + 4 * K2),
        transcendentals=B * 4 * K2,
        bytes_accessed=4 * (B * (10 + K + (4 * K + 1)) + pp.size),
    )

    mu, std, logit, mu2, std2 = pl.pallas_call(
        toynet_kernel,
        out_shape=(
            jax.ShapeDtypeStruct((B, K), jnp.float32),   # mu
            jax.ShapeDtypeStruct((B, K), jnp.float32),   # std
            jax.ShapeDtypeStruct((B, 1), jnp.float32),   # logit
            jax.ShapeDtypeStruct((B, K), jnp.float32),   # mu2
            jax.ShapeDtypeStruct((B, K), jnp.float32),   # std2
        ),
        grid=grid,
        in_specs=[
            pl.BlockSpec((tb, 10), lambda i: (i, 0)),
            pl.BlockSpec((tb, K), lambda i: (i, 0)),
            pl.BlockSpec(pp.shape, lambda i: (0, 0)),    # params: fetched once
        ],
        out_specs=(
            pl.BlockSpec((tb, K), lambda i: (i, 0)),
            pl.BlockSpec((tb, K), lambda i: (i, 0)),
            pl.BlockSpec((tb, 1), lambda i: (i, 0)),
            pl.BlockSpec((tb, K), lambda i: (i, 0)),
            pl.BlockSpec((tb, K), lambda i: (i, 0)),
        ),
        compiler_params=pltpu.CompilerParams(
            dimension_semantics=("parallel",),
            vmem_limit_bytes=vmem_limit,
        ),
        cost_estimate=cost,
    )(x, eps, pp)

    return (mu, std), logit, (mu2, std2)


def init_params(key):
    """Raw (torch-equivalent) params: xavier-uniform (relu gain), zero biases."""
    def xavier(key, fan_in, fan_out):
        gain = jnp.sqrt(2.0)
        bound = gain * jnp.sqrt(6.0 / (fan_in + fan_out))
        return jax.random.uniform(key, (fan_in, fan_out), jnp.float32, -bound, bound)

    k1, k2, k3, k4 = jax.random.split(key, 4)
    return {
        "w1": xavier(k1, 10, 20), "b1": jnp.zeros((1, 20), jnp.float32),
        "w2": xavier(k2, 20, K2), "b2": jnp.zeros((1, K2), jnp.float32),
        "wd": xavier(k3, K, 1), "bd": jnp.zeros((1, 1), jnp.float32),
        "wbw": xavier(k4, 1, K2), "bbw": jnp.zeros((1, K2), jnp.float32),
    }


def pack_params(p):
    """Pack raw params into ONE (35, 20) kernel buffer (done once, off hot path)."""
    buf = jnp.zeros((P_ROWS, P_COLS), jnp.float32)
    buf = buf.at[0:10, :].set(p["w1"])                 # w1
    buf = buf.at[10, :].set(p["b1"][0])                # b1
    buf = buf.at[11:31, 0:K2].set(p["w2"])             # w2
    buf = buf.at[31, 0:K2].set(p["b2"][0])             # b2
    buf = buf.at[32, 0:K].set(p["wd"][:, 0])           # wd^T
    buf = buf.at[32, K].set(p["bd"][0, 0])             # bd
    buf = buf.at[33, 0:K2].set(p["wbw"][0])            # wbw
    buf = buf.at[34, 0:K2].set(p["bbw"][0])            # bbw
    return buf


def toynet_reference(x, p, eps):
    """Pure-JAX reference (uses the raw/unpacked params)."""
    sp = jax.nn.softplus
    h = jnp.maximum(x @ p["w1"] + p["b1"], 0.0)
    stats = h @ p["w2"] + p["b2"]
    mu, std = stats[:, :K], sp(stats[:, K:] - 5.0)
    enc = mu + eps * std
    logit = enc @ p["wd"] + p["bd"]
    stats2 = logit @ p["wbw"] + p["bbw"]
    mu2, std2 = stats2[:, :K], sp(stats2[:, K:] - 5.0)
    return (mu, std), logit, (mu2, std2)


if __name__ == "__main__":
    key = jax.random.PRNGKey(0)
    k_param, k_d1, k_d2, k_d3 = jax.random.split(key, 4)

    raw = init_params(k_param)
    packed = pack_params(raw)

    def check(B, kd):
        kx, ke = jax.random.split(kd)
        x = jax.random.normal(kx, (B, 10), jnp.float32)
        # Deterministic "normal_()" noise for reparametrize_n (num_sample=1).
        eps = jax.random.normal(ke, (B, K), jnp.float32)
        (mu, std), logit, (mu2, std2) = toynet_forward(x, packed, eps)
        jax.block_until_ready((mu, std, logit, mu2, std2))
        (rmu, rstd), rlogit, (rmu2, rstd2) = toynet_reference(x, raw, eps)
        for a, b in ((mu, rmu), (std, rstd), (logit, rlogit),
                     (mu2, rmu2), (std2, rstd2)):
            assert a.shape == b.shape, "shape mismatch vs reference"
            assert jnp.allclose(a, b, atol=1e-5, rtol=1e-5), "mismatch vs reference"

    # B=8 (single full block), B=13 (2 grid steps + ragged last block),
    # B=300 (multi-step grid, ragged last block, tile < tile_cap).
    check(8, k_d1)
    check(13, k_d2)
    check(300, k_d3)

    print("KERNEL_OK")
</pallas_src>

<mosaic_0001>
module attributes {stable_mosaic.version = 11 : i64} {
  func.func @toynet_kernel(%arg0: i32, %arg1: memref<8x10xf32, #tpu.memory_space<vmem>>, %arg2: memref<8x5xf32, #tpu.memory_space<vmem>>, %arg3: memref<35x20xf32, #tpu.memory_space<vmem>>, %arg4: memref<8x5xf32, #tpu.memory_space<vmem>>, %arg5: memref<8x5xf32, #tpu.memory_space<vmem>>, %arg6: memref<8x1xf32, #tpu.memory_space<vmem>>, %arg7: memref<8x5xf32, #tpu.memory_space<vmem>>, %arg8: memref<8x5xf32, #tpu.memory_space<vmem>>) attributes {dimension_semantics = [#tpu.dimension_semantics<parallel>], iteration_bounds = array<i64: 1>, scalar_prefetch = 0 : i64, scratch_operands = 0 : i64, tpu.core_type = #tpu.core_type<tc>, window_params = [{transform_indices = @transform_0, window_bounds = array<i64: 8, 10>}, {transform_indices = @transform_1, window_bounds = array<i64: 8, 5>}, {pipeline_mode = #tpu.pipeline_mode<synchronous>, transform_indices = @transform_2, window_bounds = array<i64: 35, 20>}, {transform_indices = @transform_3, window_bounds = array<i64: 8, 5>}, {transform_indices = @transform_4, window_bounds = array<i64: 8, 5>}, {transform_indices = @transform_5, window_bounds = array<i64: 8, 1>}, {transform_indices = @transform_6, window_bounds = array<i64: 8, 5>}, {transform_indices = @transform_7, window_bounds = array<i64: 8, 5>}]} {
    %c0 = arith.constant 0 : index
    %c0_0 = arith.constant 0 : index
    %0 = vector.load %arg1[%c0, %c0_0] : memref<8x10xf32, #tpu.memory_space<vmem>>, vector<8x10xf32>
    %c0_1 = arith.constant 0 : index
    %c0_2 = arith.constant 0 : index
    %1 = vector.load %arg2[%c0_1, %c0_2] : memref<8x5xf32, #tpu.memory_space<vmem>>, vector<8x5xf32>
    %c0_3 = arith.constant 0 : index
    %c0_4 = arith.constant 0 : index
    %2 = vector.load %arg3[%c0_3, %c0_4] : memref<35x20xf32, #tpu.memory_space<vmem>>, vector<35x20xf32>
    %3 = vector.extract_strided_slice %2 {offsets = [0, 0], sizes = [10, 20], strides = [1, 1]} : vector<35x20xf32> to vector<10x20xf32>
    %4 = vector.extract_strided_slice %2 {offsets = [10, 0], sizes = [1, 20], strides = [1, 1]} : vector<35x20xf32> to vector<1x20xf32>
    %5 = vector.extract_strided_slice %2 {offsets = [11, 0], sizes = [20, 10], strides = [1, 1]} : vector<35x20xf32> to vector<20x10xf32>
    %6 = vector.extract_strided_slice %2 {offsets = [31, 0], sizes = [1, 10], strides = [1, 1]} : vector<35x20xf32> to vector<1x10xf32>
    %7 = vector.extract_strided_slice %2 {offsets = [32, 0], sizes = [1, 5], strides = [1, 1]} : vector<35x20xf32> to vector<1x5xf32>
    %8 = vector.extract_strided_slice %2 {offsets = [32, 5], sizes = [1, 1], strides = [1, 1]} : vector<35x20xf32> to vector<1x1xf32>
    %9 = vector.extract_strided_slice %2 {offsets = [33, 0], sizes = [1, 10], strides = [1, 1]} : vector<35x20xf32> to vector<1x10xf32>
    %10 = vector.extract_strided_slice %2 {offsets = [34, 0], sizes = [1, 10], strides = [1, 1]} : vector<35x20xf32> to vector<1x10xf32>
    %cst = arith.constant dense<0.000000e+00> : vector<8x20xf32>
    %11 = tpu.matmul %0, %3, %cst {dimension_numbers = #tpu.dot_dimension_numbers<[1], [0], [0], [1], [0, 0, 1, 1], [], []>} : vector<8x10xf32>, vector<10x20xf32>, vector<8x20xf32> -> vector<8x20xf32>
    %12 = vector.broadcast %4 : vector<1x20xf32> to vector<8x20xf32>
    %13 = arith.addf %11, %12 : vector<8x20xf32>
    %cst_5 = arith.constant 0.000000e+00 : f32
    %14 = vector.broadcast %cst_5 : f32 to vector<8x20xf32>
    %15 = arith.maximumf %13, %14 : vector<8x20xf32>
    %cst_6 = arith.constant dense<0.000000e+00> : vector<8x10xf32>
    %16 = tpu.matmul %15, %5, %cst_6 {dimension_numbers = #tpu.dot_dimension_numbers<[1], [0], [0], [1], [0, 0, 1, 1], [], []>} : vector<8x20xf32>, vector<20x10xf32>, vector<8x10xf32> -> vector<8x10xf32>
    %17 = vector.broadcast %6 : vector<1x10xf32> to vector<8x10xf32>
    %18 = arith.addf %16, %17 : vector<8x10xf32>
    %19 = vector.extract_strided_slice %18 {offsets = [0, 0], sizes = [8, 5], strides = [1, 1]} : vector<8x10xf32> to vector<8x5xf32>
    %20 = vector.extract_strided_slice %18 {offsets = [0, 5], sizes = [8, 5], strides = [1, 1]} : vector<8x10xf32> to vector<8x5xf32>
    %cst_7 = arith.constant 5.000000e+00 : f32
    %21 = vector.broadcast %cst_7 : f32 to vector<8x5xf32>
    %22 = arith.subf %20, %21 : vector<8x5xf32>
    %cst_8 = arith.constant 0.000000e+00 : f32
    %23 = vector.broadcast %cst_8 : f32 to vector<8x5xf32>
    %24 = arith.maximumf %22, %23 : vector<8x5xf32>
    %25 = math.absf %22 : vector<8x5xf32>
    %cst_9 = arith.constant 0.000000e+00 : f32
    %26 = vector.broadcast %cst_9 : f32 to vector<8x5xf32>
    %27 = arith.subf %26, %25 : vector<8x5xf32>
    %28 = math.exp %27 : vector<8x5xf32>
    %29 = math.log1p %28 : vector<8x5xf32>
    %30 = arith.addf %24, %29 : vector<8x5xf32>
    %31 = arith.mulf %1, %30 : vector<8x5xf32>
    %32 = arith.addf %19, %31 : vector<8x5xf32>
    %33 = vector.broadcast %7 : vector<1x5xf32> to vector<8x5xf32>
    %34 = arith.mulf %32, %33 : vector<8x5xf32>
    %cst_10 = arith.constant dense<0.000000e+00> : vector<8xf32>
    %35 = vector.multi_reduction <add>, %34, %cst_10 [1] : vector<8x5xf32> to vector<8xf32>
    %36 = vector.shape_cast %35 : vector<8xf32> to vector<8x1xf32>
    %37 = vector.broadcast %8 : vector<1x1xf32> to vector<8x1xf32>
    %38 = arith.addf %36, %37 : vector<8x1xf32>
    %39 = vector.broadcast %38 : vector<8x1xf32> to vector<8x10xf32>
    %40 = vector.broadcast %9 : vector<1x10xf32> to vector<8x10xf32>
    %41 = arith.mulf %39, %40 : vector<8x10xf32>
    %42 = vector.broadcast %10 : vector<1x10xf32> to vector<8x10xf32>
    %43 = arith.addf %41, %42 : vector<8x10xf32>
    %44 = vector.extract_strided_slice %43 {offsets = [0, 0], sizes = [8, 5], strides = [1, 1]} : vector<8x10xf32> to vector<8x5xf32>
    %45 = vector.extract_strided_slice %43 {offsets = [0, 5], sizes = [8, 5], strides = [1, 1]} : vector<8x10xf32> to vector<8x5xf32>
    %cst_11 = arith.constant 5.000000e+00 : f32
    %46 = vector.broadcast %cst_11 : f32 to vector<8x5xf32>
    %47 = arith.subf %45, %46 : vector<8x5xf32>
    %cst_12 = arith.constant 0.000000e+00 : f32
    %48 = vector.broadcast %cst_12 : f32 to vector<8x5xf32>
    %49 = arith.maximumf %47, %48 : vector<8x5xf32>
    %50 = math.absf %47 : vector<8x5xf32>
    %cst_13 = arith.constant 0.000000e+00 : f32
    %51 = vector.broadcast %cst_13 : f32 to vector<8x5xf32>
    %52 = arith.subf %51, %50 : vector<8x5xf32>
    %53 = math.exp %52 : vector<8x5xf32>
    %54 = math.log1p %53 : vector<8x5xf32>
    %55 = arith.addf %49, %54 : vector<8x5xf32>
    %c0_14 = arith.constant 0 : index
    %c0_15 = arith.constant 0 : index
    %56 = vector.load %arg4[%c0_14, %c0_15] : memref<8x5xf32, #tpu.memory_space<vmem>>, vector<8x5xf32>
    tpu.vector_store %arg4[%c0_14, %c0_15], %19 {strides = array<i32>} : memref<8x5xf32, #tpu.memory_space<vmem>>, vector<8x5xf32>,
    %c0_16 = arith.constant 0 : index
    %c0_17 = arith.constant 0 : index
    %57 = vector.load %arg5[%c0_16, %c0_17] : memref<8x5xf32, #tpu.memory_space<vmem>>, vector<8x5xf32>
    tpu.vector_store %arg5[%c0_16, %c0_17], %30 {strides = array<i32>} : memref<8x5xf32, #tpu.memory_space<vmem>>, vector<8x5xf32>,
    %c0_18 = arith.constant 0 : index
    %c0_19 = arith.constant 0 : index
    %58 = vector.load %arg6[%c0_18, %c0_19] : memref<8x1xf32, #tpu.memory_space<vmem>>, vector<8x1xf32>
    tpu.vector_store %arg6[%c0_18, %c0_19], %38 {strides = array<i32>} : memref<8x1xf32, #tpu.memory_space<vmem>>, vector<8x1xf32>,
    %c0_20 = arith.constant 0 : index
    %c0_21 = arith.constant 0 : index
    %59 = vector.load %arg7[%c0_20, %c0_21] : memref<8x5xf32, #tpu.memory_space<vmem>>, vector<8x5xf32>
    tpu.vector_store %arg7[%c0_20, %c0_21], %44 {strides = array<i32>} : memref<8x5xf32, #tpu.memory_space<vmem>>, vector<8x5xf32>,
    %c0_22 = arith.constant 0 : index
    %c0_23 = arith.constant 0 : index
    %60 = vector.load %arg8[%c0_22, %c0_23] : memref<8x5xf32, #tpu.memory_space<vmem>>, vector<8x5xf32>
    tpu.vector_store %arg8[%c0_22, %c0_23], %55 {strides = array<i32>} : memref<8x5xf32, #tpu.memory_space<vmem>>, vector<8x5xf32>,
    return
  }
  func.func @transform_0(%arg0: i32) -> (i32, i32) {
    %c0_i32 = arith.constant 0 : i32
    %c0_i32_0 = arith.constant 0 : i32
    return %arg0, %c0_i32 : i32, i32
  }
  func.func @transform_1(%arg0: i32) -> (i32, i32) {
    %c0_i32 = arith.constant 0 : i32
    %c0_i32_0 = arith.constant 0 : i32
    return %arg0, %c0_i32 : i32, i32
  }
  func.func @transform_2(%arg0: i32) -> (i32, i32) {
    %c0_i32 = arith.constant 0 : i32
    %c0_i32_0 = arith.constant 0 : i32
    %c0_i32_1 = arith.constant 0 : i32
    return %c0_i32, %c0_i32_0 : i32, i32
  }
  func.func @transform_3(%arg0: i32) -> (i32, i32) {
    %c0_i32 = arith.constant 0 : i32
    %c0_i32_0 = arith.constant 0 : i32
    return %arg0, %c0_i32 : i32, i32
  }
  func.func @transform_4(%arg0: i32) -> (i32, i32) {
    %c0_i32 = arith.constant 0 : i32
    %c0_i32_0 = arith.constant 0 : i32
    return %arg0, %c0_i32 : i32, i32
  }
  func.func @transform_5(%arg0: i32) -> (i32, i32) {
    %c0_i32 = arith.constant 0 : i32
    %c0_i32_0 = arith.constant 0 : i32
    return %arg0, %c0_i32 : i32, i32
  }
  func.func @transform_6(%arg0: i32) -> (i32, i32) {
    %c0_i32 = arith.constant 0 : i32
    %c0_i32_0 = arith.constant 0 : i32
    return %arg0, %c0_i32 : i32, i32
  }
  func.func @transform_7(%arg0: i32) -> (i32, i32) {
    %c0_i32 = arith.constant 0 : i32
    %c0_i32_0 = arith.constant 0 : i32
    return %arg0, %c0_i32 : i32, i32
  }
}

</mosaic_0001>

<bundles_post_ra>
// kernel: tpu_custom_call.1
= control target key start
LH: loop header
LB: loop body
LE: loop exit
PB: predicated region body
PF: predicated region fallthrough
CT: control target
= control target key end

     0   :  { %13 = vsyncpa [#allocation3], 0  ;;  %s445_s0 = inlined_call_operand.vmem [shape: f32[8,10], index: 0, kind: input, shape index: {}]   ;;  %s446_s1 = inlined_call_operand.vmem [shape: f32[8,5], index: 1, kind: input, shape index: {}]   ;;  %s447_s2 = inlined_call_operand.vmem [shape: f32[35,20], index: 2, kind: input, shape index: {}]   ;;  %s448_s3 = inlined_call_operand.hbm [shape: f32[8,5], index: 3, kind: output, shape index: {0}]   ;;  %s449_s4 = inlined_call_operand.hbm [shape: f32[8,5], index: 4, kind: output, shape index: {1}]   ;;  %s450_s5 = inlined_call_operand.vmem [shape: f32[8,1], index: 5, kind: output, shape index: {2}]   ;;  %s451_s6 = inlined_call_operand.hbm [shape: f32[8,5], index: 6, kind: output, shape index: {3}]   ;;  %s452_s7 = inlined_call_operand.hbm [shape: f32[8,5], index: 7, kind: output, shape index: {4}]  }
   0x1   :  { %14 = vsyncpa [#allocation5], 0  ;;  %v25_v0 = vld [vmem:[%s447_s2 + $0x8] sm:$0xff]  ;;  %vm34_vm0 = vcmask 1041408   ;;  %v24_v1 = vld [vmem:[%s447_s2] sm:$0xff]  ;;  %vm30_vm1 = vcmask 80896  }
   0x2   :  { %231 = vmatpush.msk.msra.mxu0 %vm34_vm0, %v25_v0  ;;  %v22_v2 = vld [vmem:[%s445_s0] sm:$0xff] }
   0x3   :  { %15 = vsyncpa [#allocation8], 0  ;;  %v27_v3 = vld [vmem:[%s447_s2 + $0x18] sm:$0xff]  ;;  %v26_v5 = vld [vmem:[%s447_s2 + $0x10] sm:$0xff]  ;;  %v63_v6 = vrot.slane %v25_v0, 3  ;;  %vm74_vm2 = vcmask 1043456  }
   0x4   :  { %53 = vmatpush.msra.mxu0 %v24_v1  ;;  %v66_v4 = vrot.slane %v27_v3, 3  ;;  %v64_v7 = vrot.slane %v26_v5, 3  ;;  %vm62_vm3 = vcmask 1044480   ;;  %v29_v10 = vperm.slane %v25_v0, 2  ;;  %s355_s0 = smov 123   ;;  %v23_v32 = vld [vmem:[%s446_s1] sm:$0xff] }
   0x5   :  { %232 = vmatmul.msk.f32.vlgmr.msra.gmra.mxu0 %vm30_vm1, %v22_v2  ;;  %vm70_vm4 = vcmask 162816   ;;  %v59_v14 = vperm.slane %v27_v3, 7  ;;  %vm121_vm5 = vcmask 39936   ;;  %v28_v33 = vld [vmem:[%s447_s2 + $0x20] sm:$0x7]  ;;  %v356_v40 = vmov 5  }
   0x6   :  { %233 = vmatpush.msk.msra.mxu1 %vm74_vm2, %v66_v4  ;;  %v67_v8 = vsel %vm62_vm3, %v64_v7, %v66_v4  ;;  %v65_v9 = vsel %vm62_vm3, %v63_v6, %v64_v7  ;;  %v119_v36 = vperm.slane %v28_v33, 0  ;;  %243 = vset.pattern.permute.xlu1 %v356_v40  ;;  %vm156_vm7 = vcmask 7168   ;;  %s357_s15 = smov [#allocation4]   ;;  %s182_s19 = sshll.u32 %s449_s4, 4  ;;  %s183_s19 = int_to_ptr.hbm [resolvable:$true] %s182_s19 }
   0x7   :  { %244 = vset.pattern.permute.xlu0 %v356_v40  ;;  %v131_v44 = vperm.slane %v28_v33, 1  ;;  %v133_v45 = vperm.slane %v28_v33, 2  ;;  %s180_s16 = sshll.u32 %s357_s15, 4  ;;  %s171_s21 = sshll.u32 %s448_s3, 4  ;;  %s181_s16 = int_to_ptr.vmem [resolvable:$true] %s180_s16  ;;  %s172_s21 = int_to_ptr.hbm [resolvable:$true] %s171_s21 }
   0x8   :  { %91 = vmatpush.msra.mxu1 %v67_v8  ;;  %s358_s22 = smov [#allocation2]   ;;  %s359_s24 = smov [#allocation6]  }
   0x9   :  { %s169_s23 = sshll.u32 %s358_s22, 4  ;;  %s193_s25 = sshll.u32 %s359_s24, 4  ;;  %s170_s23 = int_to_ptr.vmem [resolvable:$true] %s169_s23  ;;  %s194_s25 = int_to_ptr.vmem [resolvable:$true] %s193_s25 }
   0xa   :  { %92 = vmatpush.msra.mxu1 %v65_v9  ;;  %s195_s27 = sshll.u32 %s451_s6, 4  ;;  %s360_s3 = smov [#allocation7]   ;;  %s196_s27 = int_to_ptr.hbm [resolvable:$true] %s195_s27 }
   0xb   :  { %s204_s28 = sshll.u32 %s360_s3, 4  ;;  %s206_s8 = sshll.u32 %s452_s7, 4  ;;  %s205_s28 = int_to_ptr.vmem [resolvable:$true] %s204_s28  ;;  %s207_s8 = int_to_ptr.hbm [resolvable:$true] %s206_s8 }
  0x82   :  { %v55_v11 = vpop.f32.mrf.mxu0 }
  0x83   :  { %v56_v12 = vadd.f32 %v55_v11, %v29_v10 }
  0x85   :  { %v58_v13 = vmax.f32 %v56_v12, 0.0 }
  0x87   :  { %234 = vmatmul.msk.f32.vlgmr.msra.gmra.mxu1 %vm70_vm4, %v58_v13 }
 0x104   :  { %v94_v15 = vpop.f32.mrf.mxu1 }
 0x105   :  { %v95_v16 = vadd.f32 %v94_v15, %v59_v14 }
 0x107   :  { %v235_v17 = vadd.f32 -5.0, %v95_v16  ;;  %151 = vst.msk [vmem:[#allocation2] sm:$0xff] %vm121_vm5, %v95_v16 }
 0x108   :  { %174 = dma.vmem_to_hbm [thread:$0]  %s170_s23, 128, %s172_s21, [#allocation3]  }
 0x109   :  { %v99_v18 = vand.u32 2147483647, %v235_v17  ;;  %v98_v29 = vmax.f32 %v235_v17, 0.0 }
 0x10b   :  { %v100_v19 = vsub.f32 0.0, %v99_v18 }
 0x10d   :  { %v101_v20 = vmul.f32 1.442695, %v100_v19 }
 0x10f   :  { %245 = vpow2.f32 %v101_v20 }
 0x115   :  { %v246_v21 = vpop.eup %245 }
 0x116   :  { %v103_v22 = vadd.f32 1.0, %v246_v21  ;;  %v106_v23 = vmul.f32 -0.5, %v246_v21  ;;  %v109_v25 = vand.u32 2147483647, %v246_v21 }
 0x118   :  { %247 = vlog2.f32 %v103_v22  ;;  %v107_v24 = vadd.f32 1.0, %v106_v23  ;;  %vm110_vm6 = vcmp.lt.f32.partialorder %v109_v25, 0.0004427343 }
 0x11a   :  { %v108_v28 = vmul.f32 %v246_v21, %v107_v24 }
 0x11e   :  { %v248_v26 = vpop.eup %247 }
 0x11f   :  { %v105_v27 = vmul.f32 0.6931472, %v248_v26 }
 0x121   :  { %v111_v30 = vsel %vm110_vm6, %v108_v28, %v105_v27 }
 0x122   :  { %v112_v31 = vadd.f32 %v111_v30, %v98_v29 }
 0x124   :  { %114 = vrot.lane.b32.xlu0 %v112_v31, %s355_s0 }
 0x196   :  { %v115_v34 = vpop.permute.xlu0 %114 }
 0x197   :  { %v117_v35 = vmul.f32 %v115_v34, %v23_v32  ;;  %152 = vst.msk [vmem:[#allocation4] sm:$0xff] %vm121_vm5, %v115_v34 }
 0x198   :  { %185 = dma.vmem_to_hbm [thread:$0]  %s181_s16, 128, %s183_s19, [#allocation5]  }
 0x199   :  { %v118_v37 = vadd.f32 %v117_v35, %v95_v16 }
 0x19b   :  { %v120_v38 = vmul.f32 %v119_v36, %v118_v37 }
 0x19d   :  { %v122_v39 = vsel %vm121_vm5, %v120_v38, 0.0 }
 0x19e   :  { %123 = vadd.xlane.f32.xlu0 %v122_v39 }
 0x211   :  { %v124_v41 = vpop.xlane.xlu0 %123 }
 0x212   :  { %v125_v42 = vadd.f32 %v124_v41, %v119_v36 }
 0x214   :  { %153 = vrot.lane.b32.xlu2 %v125_v42, %s355_s0  ;;  %128 = vperm.xlu1 %243, %v125_v42  }
 0x26e   :  { %v154_v43 = vpop.permute.xlu2 %153 }
 0x26f   :  { %157 = vst.msk [vmem:[%s450_s5] sm:$0xff] %vm156_vm7, %v154_v43 }
 0x286   :  { %v129_v46 = vpop.permute.xlu1 %128 }
 0x287   :  { %v132_v47 = vmul.f32 %v131_v44, %v129_v46 }
 0x289   :  { %v134_v48 = vadd.f32 %v133_v45, %v132_v47 }
 0x28b   :  { %v236_v49 = vadd.f32 -5.0, %v134_v48  ;;  %158 = vst.msk [vmem:[#allocation6] sm:$0xff] %vm121_vm5, %v134_v48 }
 0x28c   :  { %198 = dma.vmem_to_hbm [thread:$0]  %s194_s25, 128, %s196_s27, [#allocation5]  }
 0x28d   :  { %v137_v50 = vand.u32 2147483647, %v236_v49  ;;  %v136_v61 = vmax.f32 %v236_v49, 0.0 }
 0x28f   :  { %v138_v51 = vsub.f32 0.0, %v137_v50 }
 0x291   :  { %v139_v52 = vmul.f32 1.442695, %v138_v51 }
 0x293   :  { %249 = vpow2.f32 %v139_v52 }
 0x299   :  { %v250_v53 = vpop.eup %249 }
 0x29a   :  { %v141_v54 = vadd.f32 1.0, %v250_v53  ;;  %v144_v55 = vmul.f32 -0.5, %v250_v53  ;;  %v147_v57 = vand.u32 2147483647, %v250_v53 }
 0x29c   :  { %251 = vlog2.f32 %v141_v54  ;;  %v145_v56 = vadd.f32 1.0, %v144_v55  ;;  %vm148_vm8 = vcmp.lt.f32.partialorder %v147_v57, 0.0004427343 }
 0x29e   :  { %v146_v60 = vmul.f32 %v250_v53, %v145_v56 }
 0x2a2   :  { %v252_v58 = vpop.eup %251 }
 0x2a3   :  { %v143_v59 = vmul.f32 0.6931472, %v252_v58 }
 0x2a5   :  { %v149_v62 = vsel %vm148_vm8, %v146_v60, %v143_v59 }
 0x2a6   :  { %v150_v63 = vadd.f32 %v149_v62, %v136_v61 }
 0x2a8   :  { %160 = vrot.lane.b32.xlu1 %v150_v63, %s355_s0 }
 0x31a   :  { %v161_v0 = vpop.permute.xlu1 %160 }
 0x31b   :  { %163 = vst.msk [vmem:[#allocation7] sm:$0xff] %vm121_vm5, %v161_v0 }
 0x31c   :  { %209 = dma.vmem_to_hbm [thread:$0]  %s205_s28, 128, %s207_s8, [#allocation8]  }
 0x31d   :  { %349 = dma.done.wait [#allocation3], 128  }
 0x31e   :  { %350 = vsyncadd [#allocation3], 4294967168 }
 0x31f   :  { %351 = dma.done.wait [#allocation5], 256  }
 0x320   :  { %352 = vsyncadd [#allocation5], 4294967040 }
 0x321   :  { %353 = dma.done.wait [#allocation8], 128  }
 0x322   :  { %354 = vsyncadd [#allocation8], 4294967168 }
 0x323   :  { %228 = vsyncpa [#allocation3], 1 }
 0x324   :  { %229 = vsyncpa [#allocation5], 1 }
 0x325   :  { %230 = vsyncpa [#allocation8], 1 }

</bundles_post_ra>
